<compile_context>
chip_gen: v6e
topology: v6e:2x2x1
jax: 0.10.0
libtpu: 0.0.40
codegen_flags: <defaults>
</compile_context>

<pallas_src>
import functools

import jax
import jax.numpy as jnp
from jax import lax
from jax.experimental import pallas as pl
from jax.experimental.pallas import tpu as pltpu


# ----------------------------------------------------------------------------- helpers
def _round_up(x, m):
    return ((x + m - 1) // m) * m


def _cdiv(a, b):
    return -(-a // b)


def _conv_tile(xw, w_ref, *, taps, stride, tl):
    """Conv on one halo'd input slab: sum_k W[k] @ x[:, k::stride] -> (C_out, TL) f32.

    xw    : (C_in, slab) loaded slab value, slab = (TL-1)*stride + K
    w_ref : (K, C_out, C_in) weight ref (grid-resident)
    """
    def tap(k):
        if stride == 1:
            xs = xw[:, k:k + tl]                              # contiguous lane slice
        else:
            xs = xw[:, k:k + (tl - 1) * stride + 1:stride]    # strided path (stride > 1)
        return jnp.dot(w_ref[k], xs, preferred_element_type=jnp.float32)

    y = tap(0)
    for k in range(1, taps):                                  # K small & static -> unrolled
        y = y + tap(k)
    return y                                                  # (C_out, TL) f32


# ----------------------------------------------------------------------------- pass 1
def stats_kernel(xw_ref, w_ref, sum_ref, sq_ref, *, taps, stride, tl, l_out):
    # xw_ref  : (1, 1, C_in, slab)   halo'd input slab for this (batch, L-tile)
    # w_ref   : (K, C_out, C_in)     full weight
    # sum_ref : (1, C_out, 1)        per-batch partial sum   (accumulated over L-tiles)
    # sq_ref  : (1, C_out, 1)        per-batch partial sumsq (accumulated over L-tiles)
    ji = pl.program_id(1)

    @pl.when(ji == 0)
    def _init():
        sum_ref[...] = jnp.zeros_like(sum_ref)
        sq_ref[...] = jnp.zeros_like(sq_ref)

    y = _conv_tile(xw_ref[0, 0], w_ref, taps=taps, stride=stride, tl=tl)

    # Mask padded columns (>= true L_out) out of the BN statistics.
    col = ji * tl + lax.broadcasted_iota(jnp.int32, (1, tl), 1)
    ym = jnp.where(col < l_out, y, 0.0)
    sum_ref[0] += jnp.sum(ym, axis=1, keepdims=True)
    sq_ref[0] += jnp.sum(ym * ym, axis=1, keepdims=True)


# ----------------------------------------------------------------------------- pass 2
def conv_bn_relu_kernel(xw_ref, w_ref, scale_ref, shift_ref, o_ref, *, taps, stride, tl):
    # Recompute conv tile, then out = max(y * scale + shift, 0).
    y = _conv_tile(xw_ref[0, 0], w_ref, taps=taps, stride=stride, tl=tl)
    o_ref[0] = jnp.maximum(y * scale_ref[...] + shift_ref[...], 0.0).astype(o_ref.dtype)


# ----------------------------------------------------------------------------- wrapper
def conv1d_bn(x, weight, gamma, beta, *, stride=1, padding=1, eps=1e-5, tile_l=512):
    """x: (N, C_in, L), weight: (C_out, C_in, K) -> (N, C_out, L_out). Training-mode BN."""
    n, c_in, l = x.shape
    c_out, c_in_w, k = weight.shape
    assert c_in_w == c_in, "weight C_in mismatch"

    l_out = (l + 2 * padding - k) // stride + 1
    assert l_out >= 1
    tl = min(_round_up(tile_l, 128), _round_up(l_out, 128))   # 128-aligned lane tile
    n_tiles = _cdiv(l_out, tl)
    l_out_pad = n_tiles * tl
    slab = (tl - 1) * stride + k                              # input slab per tile

    # Pad input once (conv padding + enough to cover the last, partially-valid tile).
    l_in_needed = (l_out_pad - 1) * stride + k
    right_pad = max(l_in_needed - l - padding, 0)
    x_pad = jnp.pad(x.astype(jnp.float32), ((0, 0), (0, 0), (padding, right_pad)))

    # Overlapping windows: only (k - stride) halo columns duplicated per tile (~1-2%).
    x_win = jnp.stack(
        [lax.slice_in_dim(x_pad, j * tl * stride, j * tl * stride + slab, axis=2)
         for j in range(n_tiles)],
        axis=1)                                               # (N, n_tiles, C_in, slab)

    w_koc = jnp.transpose(weight.astype(jnp.float32), (2, 0, 1))  # (K, C_out, C_in)

    x_spec = pl.BlockSpec((1, 1, c_in, slab), lambda i, j: (i, j, 0, 0))
    w_spec = pl.BlockSpec((k, c_out, c_in), lambda i, j: (0, 0, 0))
    vec_spec = pl.BlockSpec((c_out, 1), lambda i, j: (0, 0))
    cparams = dict(vmem_limit_bytes=64 * 1024 * 1024)

    # ---- pass 1: per-batch partial BN stats (batch axis parallel, L-tile axis serial).
    kernel1 = functools.partial(stats_kernel, taps=k, stride=stride, tl=tl, l_out=l_out)
    s1, s2 = pl.pallas_call(
        kernel1,
        out_shape=(jax.ShapeDtypeStruct((n, c_out, 1), jnp.float32),
                   jax.ShapeDtypeStruct((n, c_out, 1), jnp.float32)),
        grid_spec=pltpu.PrefetchScalarGridSpec(
            num_scalar_prefetch=0,
            grid=(n, n_tiles),
            in_specs=[x_spec, w_spec],
            out_specs=(pl.BlockSpec((1, c_out, 1), lambda i, j: (i, 0, 0)),
                       pl.BlockSpec((1, c_out, 1), lambda i, j: (i, 0, 0))),
        ),
        compiler_params=pltpu.CompilerParams(
            dimension_semantics=("parallel", "arbitrary"), **cparams),
    )(x_win, w_koc)

    # ---- tiny XLA epilogue: finalize BN stats, fold affine into (scale, shift).
    count = jnp.float32(n * l_out)
    mean = jnp.sum(s1, axis=0) / count                        # (C_out, 1)
    var = jnp.maximum(jnp.sum(s2, axis=0) / count - mean * mean, 0.0)  # biased (train-mode)
    inv_std = lax.rsqrt(var + eps)
    scale = gamma.reshape(c_out, 1).astype(jnp.float32) * inv_std
    shift = beta.reshape(c_out, 1).astype(jnp.float32) - mean * scale

    # ---- pass 2: recompute conv + folded BN + ReLU; fully parallel grid (both TCs on v7x).
    kernel2 = functools.partial(conv_bn_relu_kernel, taps=k, stride=stride, tl=tl)
    out = pl.pallas_call(
        kernel2,
        out_shape=jax.ShapeDtypeStruct((n, c_out, l_out), jnp.float32),
        grid_spec=pltpu.PrefetchScalarGridSpec(
            num_scalar_prefetch=0,
            grid=(n, n_tiles),
            in_specs=[x_spec, w_spec, vec_spec, vec_spec],
            out_specs=pl.BlockSpec((1, c_out, tl), lambda i, j: (i, 0, j)),
        ),
        compiler_params=pltpu.CompilerParams(
            dimension_semantics=("parallel", "parallel"), **cparams),
    )(x_win, w_koc, scale, shift)

    return out


# ----------------------------------------------------------------------------- reference
def conv1d_bn_reference(x, weight, gamma, beta, *, stride=1, padding=1, eps=1e-5):
    y = lax.conv_general_dilated(
        x.astype(jnp.float32), weight.astype(jnp.float32),
        window_strides=(stride,), padding=[(padding, padding)],
        dimension_numbers=("NCH", "OIH", "NCH"))
    mean = jnp.mean(y, axis=(0, 2), keepdims=True)
    var = jnp.mean((y - mean) ** 2, axis=(0, 2), keepdims=True)
    y = gamma[None, :, None] * (y - mean) * lax.rsqrt(var + eps) + beta[None, :, None]
    return jnp.maximum(y, 0.0)


if __name__ == "__main__":
    # Deterministic setup consistent with Conv1dBN(in_chans=4, out_chans=8, kernel_size=3).
    key = jax.random.PRNGKey(0)
    k_x, k_w, k_g, k_b = jax.random.split(key, 4)

    N, C_IN, L = 2, 4, 16
    C_OUT, K = 8, 3
    STRIDE, PADDING = 1, 1

    x = jax.random.normal(k_x, (N, C_IN, L), dtype=jnp.float32)
    weight = jax.random.normal(k_w, (C_OUT, C_IN, K), dtype=jnp.float32) * 0.1
    gamma = 1.0 + 0.1 * jax.random.normal(k_g, (C_OUT,), dtype=jnp.float32)
    beta = 0.1 * jax.random.normal(k_b, (C_OUT,), dtype=jnp.float32)

    fn = jax.jit(functools.partial(conv1d_bn, stride=STRIDE, padding=PADDING))
    out = jax.block_until_ready(fn(x, weight, gamma, beta))

    ref = conv1d_bn_reference(x, weight, gamma, beta, stride=STRIDE, padding=PADDING)
    assert out.shape == ref.shape == (N, C_OUT, L)
    max_diff = float(jnp.max(jnp.abs(out - ref)))
    assert jnp.allclose(out, ref, atol=1e-4, rtol=1e-4), f"max abs diff {max_diff}"

    print("KERNEL_OK")
</pallas_src>

<mosaic_0001>
module attributes {stable_mosaic.version = 11 : i64} {
  func.func @stats_kernel(%arg0: i32, %arg1: i32, %arg2: memref<1x1x4x130xf32, #tpu.memory_space<vmem>>, %arg3: memref<3x8x4xf32, #tpu.memory_space<vmem>>, %arg4: memref<1x8x1xf32, #tpu.memory_space<vmem>>, %arg5: memref<1x8x1xf32, #tpu.memory_space<vmem>>) attributes {dimension_semantics = [#tpu.dimension_semantics<parallel>, #tpu.dimension_semantics<arbitrary>], iteration_bounds = array<i64: 2, 1>, scalar_prefetch = 0 : i64, scratch_operands = 0 : i64, tpu.core_type = #tpu.core_type<tc>, window_params = [{transform_indices = @transform_0, window_bounds = array<i64: 1, 1, 4, 130>}, {pipeline_mode = #tpu.pipeline_mode<synchronous>, transform_indices = @transform_1, window_bounds = array<i64: 3, 8, 4>}, {transform_indices = @transform_2, window_bounds = array<i64: 1, 8, 1>}, {transform_indices = @transform_3, window_bounds = array<i64: 1, 8, 1>}]} {
    %c0_i32 = arith.constant 0 : i32
    %0 = arith.cmpi eq, %arg1, %c0_i32 : i32
    %1 = arith.extui %0 : i1 to i32
    %c0_i32_0 = arith.constant 0 : i32
    %2 = arith.cmpi ne, %1, %c0_i32_0 : i32
    scf.if %2 {
      %cst_28 = arith.constant 0.000000e+00 : f32
      %46 = vector.broadcast %cst_28 : f32 to vector<1x8x1xf32>
      %c0_29 = arith.constant 0 : index
      %c0_30 = arith.constant 0 : index
      %c0_31 = arith.constant 0 : index
      %47 = vector.load %arg4[%c0_29, %c0_30, %c0_31] : memref<1x8x1xf32, #tpu.memory_space<vmem>>, vector<1x8x1xf32>
      tpu.vector_store %arg4[%c0_29, %c0_30, %c0_31], %46 {strides = array<i32>} : memref<1x8x1xf32, #tpu.memory_space<vmem>>, vector<1x8x1xf32>,
      %cst_32 = arith.constant 0.000000e+00 : f32
      %48 = vector.broadcast %cst_32 : f32 to vector<1x8x1xf32>
      %c0_33 = arith.constant 0 : index
      %c0_34 = arith.constant 0 : index
      %c0_35 = arith.constant 0 : index
      %49 = vector.load %arg5[%c0_33, %c0_34, %c0_35] : memref<1x8x1xf32, #tpu.memory_space<vmem>>, vector<1x8x1xf32>
      tpu.vector_store %arg5[%c0_33, %c0_34, %c0_35], %48 {strides = array<i32>} : memref<1x8x1xf32, #tpu.memory_space<vmem>>, vector<1x8x1xf32>,
    } else {
    }
    %c0 = arith.constant 0 : index
    %c0_1 = arith.constant 0 : index
    %c0_2 = arith.constant 0 : index
    %c0_3 = arith.constant 0 : index
    %3 = vector.load %arg2[%c0, %c0_1, %c0_2, %c0_3] : memref<1x1x4x130xf32, #tpu.memory_space<vmem>>, vector<1x1x4x130xf32>
    %4 = vector.shape_cast %3 : vector<1x1x4x130xf32> to vector<4x130xf32>
    %5 = vector.extract_strided_slice %4 {offsets = [0, 0], sizes = [4, 128], strides = [1, 1]} : vector<4x130xf32> to vector<4x128xf32>
    %c0_4 = arith.constant 0 : index
    %c0_5 = arith.constant 0 : index
    %c0_6 = arith.constant 0 : index
    %6 = vector.load %arg3[%c0_4, %c0_5, %c0_6] : memref<3x8x4xf32, #tpu.memory_space<vmem>>, vector<1x8x4xf32>
    %7 = vector.shape_cast %6 : vector<1x8x4xf32> to vector<8x4xf32>
    %cst = arith.constant dense<0.000000e+00> : vector<8x128xf32>
    %8 = tpu.matmul %7, %5, %cst {dimension_numbers = #tpu.dot_dimension_numbers<[1], [0], [0], [1], [0, 0, 1, 1], [], []>} : vector<8x4xf32>, vector<4x128xf32>, vector<8x128xf32> -> vector<8x128xf32>
    %9 = vector.extract_strided_slice %4 {offsets = [0, 1], sizes = [4, 128], strides = [1, 1]} : vector<4x130xf32> to vector<4x128xf32>
    %c1 = arith.constant 1 : index
    %c0_7 = arith.constant 0 : index
    %c0_8 = arith.constant 0 : index
    %10 = vector.load %arg3[%c1, %c0_7, %c0_8] : memref<3x8x4xf32, #tpu.memory_space<vmem>>, vector<1x8x4xf32>
    %11 = vector.shape_cast %10 : vector<1x8x4xf32> to vector<8x4xf32>
    %cst_9 = arith.constant dense<0.000000e+00> : vector<8x128xf32>
    %12 = tpu.matmul %11, %9, %cst_9 {dimension_numbers = #tpu.dot_dimension_numbers<[1], [0], [0], [1], [0, 0, 1, 1], [], []>} : vector<8x4xf32>, vector<4x128xf32>, vector<8x128xf32> -> vector<8x128xf32>
    %13 = arith.addf %8, %12 : vector<8x128xf32>
    %14 = vector.extract_strided_slice %4 {offsets = [0, 2], sizes = [4, 128], strides = [1, 1]} : vector<4x130xf32> to vector<4x128xf32>
    %c2 = arith.constant 2 : index
    %c0_10 = arith.constant 0 : index
    %c0_11 = arith.constant 0 : index
    %15 = vector.load %arg3[%c2, %c0_10, %c0_11] : memref<3x8x4xf32, #tpu.memory_space<vmem>>, vector<1x8x4xf32>
    %16 = vector.shape_cast %15 : vector<1x8x4xf32> to vector<8x4xf32>
    %cst_12 = arith.constant dense<0.000000e+00> : vector<8x128xf32>
    %17 = tpu.matmul %16, %14, %cst_12 {dimension_numbers = #tpu.dot_dimension_numbers<[1], [0], [0], [1], [0, 0, 1, 1], [], []>} : vector<8x4xf32>, vector<4x128xf32>, vector<8x128xf32> -> vector<8x128xf32>
    %18 = arith.addf %13, %17 : vector<8x128xf32>
    %c128_i32 = arith.constant 128 : i32
    %19 = arith.muli %arg1, %c128_i32 : i32
    %20 = tpu.iota {dimensions = array<i32: 1>} : vector<1x128xi32>
    %21 = vector.broadcast %19 : i32 to vector<1x128xi32>
    %22 = arith.addi %21, %20 : vector<1x128xi32>
    %c16_i32 = arith.constant 16 : i32
    %23 = vector.broadcast %c16_i32 : i32 to vector<1x128xi32>
    %24 = arith.cmpi slt, %22, %23 : vector<1x128xi32>
    %cst_13 = arith.constant 0.000000e+00 : f32
    %25 = vector.shape_cast %24 : vector<1x128xi1> to vector<1x128xi1>
    %26 = vector.broadcast %25 : vector<1x128xi1> to vector<8x128xi1>
    %27 = vector.broadcast %cst_13 : f32 to vector<8x128xf32>
    %28 = arith.select %26, %18, %27 : vector<8x128xi1>, vector<8x128xf32>
    %c0_14 = arith.constant 0 : index
    %c0_15 = arith.constant 0 : index
    %c0_16 = arith.constant 0 : index
    %29 = vector.load %arg4[%c0_14, %c0_15, %c0_16] : memref<1x8x1xf32, #tpu.memory_space<vmem>>, vector<1x8x1xf32>
    %30 = vector.shape_cast %29 : vector<1x8x1xf32> to vector<8x1xf32>
    %cst_17 = arith.constant dense<0.000000e+00> : vector<8xf32>
    %31 = vector.multi_reduction <add>, %28, %cst_17 [1] : vector<8x128xf32> to vector<8xf32>
    %32 = vector.shape_cast %31 : vector<8xf32> to vector<8x1xf32>
    %33 = arith.addf %30, %32 : vector<8x1xf32>
    %c0_18 = arith.constant 0 : index
    %c0_19 = arith.constant 0 : index
    %c0_20 = arith.constant 0 : index
    %34 = vector.load %arg4[%c0_18, %c0_19, %c0_20] : memref<1x8x1xf32, #tpu.memory_space<vmem>>, vector<1x8x1xf32>
    %35 = vector.shape_cast %34 : vector<1x8x1xf32> to vector<8x1xf32>
    %36 = vector.shape_cast %33 : vector<8x1xf32> to vector<1x8x1xf32>
    tpu.vector_store %arg4[%c0_18, %c0_19, %c0_20], %36 {strides = array<i32>} : memref<1x8x1xf32, #tpu.memory_space<vmem>>, vector<1x8x1xf32>,
    %c0_21 = arith.constant 0 : index
    %c0_22 = arith.constant 0 : index
    %c0_23 = arith.constant 0 : index
    %37 = vector.load %arg5[%c0_21, %c0_22, %c0_23] : memref<1x8x1xf32, #tpu.memory_space<vmem>>, vector<1x8x1xf32>
    %38 = vector.shape_cast %37 : vector<1x8x1xf32> to vector<8x1xf32>
    %39 = arith.mulf %28, %28 : vector<8x128xf32>
    %cst_24 = arith.constant dense<0.000000e+00> : vector<8xf32>
    %40 = vector.multi_reduction <add>, %39, %cst_24 [1] : vector<8x128xf32> to vector<8xf32>
    %41 = vector.shape_cast %40 : vector<8xf32> to vector<8x1xf32>
    %42 = arith.addf %38, %41 : vector<8x1xf32>
    %c0_25 = arith.constant 0 : index
    %c0_26 = arith.constant 0 : index
    %c0_27 = arith.constant 0 : index
    %43 = vector.load %arg5[%c0_25, %c0_26, %c0_27] : memref<1x8x1xf32, #tpu.memory_space<vmem>>, vector<1x8x1xf32>
    %44 = vector.shape_cast %43 : vector<1x8x1xf32> to vector<8x1xf32>
    %45 = vector.shape_cast %42 : vector<8x1xf32> to vector<1x8x1xf32>
    tpu.vector_store %arg5[%c0_25, %c0_26, %c0_27], %45 {strides = array<i32>} : memref<1x8x1xf32, #tpu.memory_space<vmem>>, vector<1x8x1xf32>,
    return
  }
  func.func @transform_0(%arg0: i32, %arg1: i32) -> (i32, i32, i32, i32) {
    %c0_i32 = arith.constant 0 : i32
    %c0_i32_0 = arith.constant 0 : i32
    %c0_i32_1 = arith.constant 0 : i32
    return %arg0, %arg1, %c0_i32, %c0_i32_0 : i32, i32, i32, i32
  }
  func.func @transform_1(%arg0: i32, %arg1: i32) -> (i32, i32, i32) {
    %c0_i32 = arith.constant 0 : i32
    %c0_i32_0 = arith.constant 0 : i32
    %c0_i32_1 = arith.constant 0 : i32
    %c0_i32_2 = arith.constant 0 : i32
    return %c0_i32, %c0_i32_0, %c0_i32_1 : i32, i32, i32
  }
  func.func @transform_2(%arg0: i32, %arg1: i32) -> (i32, i32, i32) {
    %c0_i32 = arith.constant 0 : i32
    %c0_i32_0 = arith.constant 0 : i32
    %c0_i32_1 = arith.constant 0 : i32
    return %arg0, %c0_i32, %c0_i32_0 : i32, i32, i32
  }
  func.func @transform_3(%arg0: i32, %arg1: i32) -> (i32, i32, i32) {
    %c0_i32 = arith.constant 0 : i32
    %c0_i32_0 = arith.constant 0 : i32
    %c0_i32_1 = arith.constant 0 : i32
    return %arg0, %c0_i32, %c0_i32_0 : i32, i32, i32
  }
}

module attributes {stable_mosaic.version = 11 : i64} {
  func.func @conv_bn_relu_kernel(%arg0: i32, %arg1: i32, %arg2: memref<1x1x4x130xf32, #tpu.memory_space<vmem>>, %arg3: memref<3x8x4xf32, #tpu.memory_space<vmem>>, %arg4: memref<8x1xf32, #tpu.memory_space<vmem>>, %arg5: memref<8x1xf32, #tpu.memory_space<vmem>>, %arg6: memref<1x8x128xf32, #tpu.memory_space<vmem>>) attributes {dimension_semantics = [#tpu.dimension_semantics<parallel>, #tpu.dimension_semantics<parallel>], iteration_bounds = array<i64: 2, 1>, scalar_prefetch = 0 : i64, scratch_operands = 0 : i64, tpu.core_type = #tpu.core_type<tc>, window_params = [{transform_indices = @transform_0, window_bounds = array<i64: 1, 1, 4, 130>}, {pipeline_mode = #tpu.pipeline_mode<synchronous>, transform_indices = @transform_1, window_bounds = array<i64: 3, 8, 4>}, {pipeline_mode = #tpu.pipeline_mode<synchronous>, transform_indices = @transform_2, window_bounds = array<i64: 8, 1>}, {pipeline_mode = #tpu.pipeline_mode<synchronous>, transform_indices = @transform_3, window_bounds = array<i64: 8, 1>}, {transform_indices = @transform_4, window_bounds = array<i64: 1, 8, 128>}]} {
    %c0 = arith.constant 0 : index
    %c0_0 = arith.constant 0 : index
    %c0_1 = arith.constant 0 : index
    %c0_2 = arith.constant 0 : index
    %0 = vector.load %arg2[%c0, %c0_0, %c0_1, %c0_2] : memref<1x1x4x130xf32, #tpu.memory_space<vmem>>, vector<1x1x4x130xf32>
    %1 = vector.shape_cast %0 : vector<1x1x4x130xf32> to vector<4x130xf32>
    %2 = vector.extract_strided_slice %1 {offsets = [0, 0], sizes = [4, 128], strides = [1, 1]} : vector<4x130xf32> to vector<4x128xf32>
    %c0_3 = arith.constant 0 : index
    %c0_4 = arith.constant 0 : index
    %c0_5 = arith.constant 0 : index
    %3 = vector.load %arg3[%c0_3, %c0_4, %c0_5] : memref<3x8x4xf32, #tpu.memory_space<vmem>>, vector<1x8x4xf32>
    %4 = vector.shape_cast %3 : vector<1x8x4xf32> to vector<8x4xf32>
    %cst = arith.constant dense<0.000000e+00> : vector<8x128xf32>
    %5 = tpu.matmul %4, %2, %cst {dimension_numbers = #tpu.dot_dimension_numbers<[1], [0], [0], [1], [0, 0, 1, 1], [], []>} : vector<8x4xf32>, vector<4x128xf32>, vector<8x128xf32> -> vector<8x128xf32>
    %6 = vector.extract_strided_slice %1 {offsets = [0, 1], sizes = [4, 128], strides = [1, 1]} : vector<4x130xf32> to vector<4x128xf32>
    %c1 = arith.constant 1 : index
    %c0_6 = arith.constant 0 : index
    %c0_7 = arith.constant 0 : index
    %7 = vector.load %arg3[%c1, %c0_6, %c0_7] : memref<3x8x4xf32, #tpu.memory_space<vmem>>, vector<1x8x4xf32>
    %8 = vector.shape_cast %7 : vector<1x8x4xf32> to vector<8x4xf32>
    %cst_8 = arith.constant dense<0.000000e+00> : vector<8x128xf32>
    %9 = tpu.matmul %8, %6, %cst_8 {dimension_numbers = #tpu.dot_dimension_numbers<[1], [0], [0], [1], [0, 0, 1, 1], [], []>} : vector<8x4xf32>, vector<4x128xf32>, vector<8x128xf32> -> vector<8x128xf32>
    %10 = arith.addf %5, %9 : vector<8x128xf32>
    %11 = vector.extract_strided_slice %1 {offsets = [0, 2], sizes = [4, 128], strides = [1, 1]} : vector<4x130xf32> to vector<4x128xf32>
    %c2 = arith.constant 2 : index
    %c0_9 = arith.constant 0 : index
    %c0_10 = arith.constant 0 : index
    %12 = vector.load %arg3[%c2, %c0_9, %c0_10] : memref<3x8x4xf32, #tpu.memory_space<vmem>>, vector<1x8x4xf32>
    %13 = vector.shape_cast %12 : vector<1x8x4xf32> to vector<8x4xf32>
    %cst_11 = arith.constant dense<0.000000e+00> : vector<8x128xf32>
    %14 = tpu.matmul %13, %11, %cst_11 {dimension_numbers = #tpu.dot_dimension_numbers<[1], [0], [0], [1], [0, 0, 1, 1], [], []>} : vector<8x4xf32>, vector<4x128xf32>, vector<8x128xf32> -> vector<8x128xf32>
    %15 = arith.addf %10, %14 : vector<8x128xf32>
    %c0_12 = arith.constant 0 : index
    %c0_13 = arith.constant 0 : index
    %16 = vector.load %arg4[%c0_12, %c0_13] : memref<8x1xf32, #tpu.memory_space<vmem>>, vector<8x1xf32>
    %17 = vector.broadcast %16 : vector<8x1xf32> to vector<8x128xf32>
    %18 = arith.mulf %15, %17 : vector<8x128xf32>
    %c0_14 = arith.constant 0 : index
    %c0_15 = arith.constant 0 : index
    %19 = vector.load %arg5[%c0_14, %c0_15] : memref<8x1xf32, #tpu.memory_space<vmem>>, vector<8x1xf32>
    %20 = vector.broadcast %19 : vector<8x1xf32> to vector<8x128xf32>
    %21 = arith.addf %18, %20 : vector<8x128xf32>
    %cst_16 = arith.constant 0.000000e+00 : f32
    %22 = vector.broadcast %cst_16 : f32 to vector<8x128xf32>
    %23 = arith.maximumf %21, %22 : vector<8x128xf32>
    %c0_17 = arith.constant 0 : index
    %c0_18 = arith.constant 0 : index
    %c0_19 = arith.constant 0 : index
    %24 = vector.load %arg6[%c0_17, %c0_18, %c0_19] : memref<1x8x128xf32, #tpu.memory_space<vmem>>, vector<1x8x128xf32>
    %25 = vector.shape_cast %24 : vector<1x8x128xf32> to vector<8x128xf32>
    %26 = vector.shape_cast %23 : vector<8x128xf32> to vector<1x8x128xf32>
    tpu.vector_store %arg6[%c0_17, %c0_18, %c0_19], %26 {strides = array<i32>} : memref<1x8x128xf32, #tpu.memory_space<vmem>>, vector<1x8x128xf32>,
    return
  }
  func.func @transform_0(%arg0: i32, %arg1: i32) -> (i32, i32, i32, i32) {
    %c0_i32 = arith.constant 0 : i32
    %c0_i32_0 = arith.constant 0 : i32
    %c0_i32_1 = arith.constant 0 : i32
    return %arg0, %arg1, %c0_i32, %c0_i32_0 : i32, i32, i32, i32
  }
  func.func @transform_1(%arg0: i32, %arg1: i32) -> (i32, i32, i32) {
    %c0_i32 = arith.constant 0 : i32
    %c0_i32_0 = arith.constant 0 : i32
    %c0_i32_1 = arith.constant 0 : i32
    %c0_i32_2 = arith.constant 0 : i32
    return %c0_i32, %c0_i32_0, %c0_i32_1 : i32, i32, i32
  }
  func.func @transform_2(%arg0: i32, %arg1: i32) -> (i32, i32) {
    %c0_i32 = arith.constant 0 : i32
    %c0_i32_0 = arith.constant 0 : i32
    %c0_i32_1 = arith.constant 0 : i32
    return %c0_i32, %c0_i32_0 : i32, i32
  }
  func.func @transform_3(%arg0: i32, %arg1: i32) -> (i32, i32) {
    %c0_i32 = arith.constant 0 : i32
    %c0_i32_0 = arith.constant 0 : i32
    %c0_i32_1 = arith.constant 0 : i32
    return %c0_i32, %c0_i32_0 : i32, i32
  }
  func.func @transform_4(%arg0: i32, %arg1: i32) -> (i32, i32, i32) {
    %c0_i32 = arith.constant 0 : i32
    %c0_i32_0 = arith.constant 0 : i32
    return %arg0, %c0_i32, %arg1 : i32, i32, i32
  }
}

</mosaic_0001>

<bundles_post_ra>
// kernel: conv1d_bn.2
= control target key start
LH: loop header
LB: loop body
LE: loop exit
PB: predicated region body
PF: predicated region fallthrough
CT: control target
= control target key end

     0   :  { %s701_s12 = smov 0   ;;  %s703_s13 = smov 0   ;;  %s764_s0 = inlined_call_operand.vmem [shape: f32[2,1,4,130], index: 0, kind: input, shape index: {}]   ;;  %s765_s1 = inlined_call_operand.vmem [shape: f32[3,8,4], index: 1, kind: input, shape index: {}]   ;;  %s766_s2 = inlined_call_operand.vmem [shape: f32[2,8,1], index: 2, kind: output, shape index: {0}]   ;;  %s767_s3 = inlined_call_operand.vmem [shape: f32[2,8,1], index: 3, kind: output, shape index: {1}]  }
   0x1   :  { %s705_s14 = smov 0  }
   0x2 LB: > { %s26_s15 = sadd.s32 1, %s671_s13  ;;  %p587_p0 = scmp.ge.s32.totalorder %s675_s14, 1  ;;  %s675_s14 = sphi %s705_s14, %s14_s14   ;;  %s671_s13 = sphi %s703_s13, %s769_s13   ;;  %s667_s12 = sphi %s701_s12, %s768_s12  }
   0x3   : > { %p28_p1 = scmp.ge.s32.totalorder %s26_s15, 2  ;;  %p158_p2 = scmp.lt.s32.totalorder %s675_s14, 3 }
   0x5   : > { %s771_s15 = smov (%p28_p1, %s26_s15), 0  ;;  %p159_p3 = pnand %p587_p0, %p158_p2 }
   0x6   : > { %p189_p4 = scmp.lt.s32.totalorder (!%p159_p3), %s667_s12, 1  ;;  %s679_s22 = smov (!%p159_p3), 126  }
   0x7   : > { %162 = sbr.rel (%p159_p3) target bundleno = 480 (0x1e0), region = 28  ;;  %s680_s23 = smov (!%p159_p3), 127  }
   0xc   : > { %v677_v0 = vmov 0.0   ;;  %s773_s12 = smov (!%p189_p4, %s667_s12), 1  ;;  %vm678_vm0 = vmmov 0   ;;  %vm229_vm1 = vcmask 1043456   ;;  %vm225_vm2 = vcmask 31744   ;;  %v214_v2 = vld [vmem:[%s765_s1] sm:$0xff] }
   0xd   : > { %609 = vmatprep.subr.mxu0 %v677_v0  ;;  %614 = vmatprep.subr.mxu1 %v677_v0  ;;  %s721_s16 = sshll.u32 %s773_s12, 3  ;;  %vm223_vm3 = vcmask 1039360   ;;  %vm383_vm4 = vcmask 1031168   ;;  %v592_v8 = vld [vmem:[%s765_s1 + $0x8] sm:$0xff]  ;;  %v597_v11 = vld [vmem:[%s765_s1 + $0x10] sm:$0xff]  ;;  %vm210_vm5 = vcmask 7168   ;;  %v462_v14 = vlaneseq }
   0xe   : > { %611 = vmatprep.mubr.msk.f32.mxu0 %vm678_vm0, %v677_v0  ;;  %616 = vmatprep.mubr.msk.f32.mxu1 %vm678_vm0, %v677_v0  ;;  %s197_s19 = scalar_lea.vmem %s764_s0, %s721_s16  ;;  %s201_s30 = scalar_lea.vmem %s766_s2, %s721_s16 }
   0xf   : > { %v213_v1 = vld [vmem:[%s197_s19] sm:$0xff]  ;;  %211 = vst.msk [vmem:[%s201_s30] sm:$0xff] %vm210_vm5, %v677_v0  ;;  %v463_v16 = vand.u32 127, %v462_v14  ;;  %s205_s6 = scalar_lea.vmem %s767_s3, %s721_s16 }
  0x10   : > { %379 = vrot.lane.b32.xlu1 %v213_v1, %s679_s22  ;;  %219 = vrot.lane.b32.xlu0 %v213_v1, %s680_s23  ;;  %v218_v3 = vcombine.high %v213_v1, %v213_v1  ;;  %212 = vst.msk [vmem:[%s205_s6] sm:$0xff] %vm210_vm5, %v677_v0 }
  0x11   : > { %615 = vmatpush3.msk.msra.mxu1 %vm229_vm1, %v213_v1  ;;  %vm466_vm6 = vcmp.lt.s32.totalorder %v463_v16, 16 }
  0x12   : > { %617 = vmatmul.mubr.msk.f32.vlgmr.msra.gmra.mxu1 %vm225_vm2, %v214_v2 }
  0x14   : > { %381 = vrot.lane.b32.xlu1 %v218_v3, %s679_s22  ;;  %221 = vrot.lane.b32.xlu0 %v218_v3, %s680_s23 }
  0x16   : > { %v470_v24 = vld [vmem:[%s201_s30] sm:$0xff] }
  0x17   : > { %v476_v26 = vld [vmem:[%s205_s6] sm:$0xff] }
  0x82   : > { %v380_v4 = vpop.permute.xlu1 %379  ;;  %v220_v5 = vpop.permute.xlu0 %219 }
  0x86   : > { %v382_v6 = vpop.permute.xlu1 %381  ;;  %v222_v7 = vpop.permute.xlu0 %221 }
  0x87   : > { %v224_v9 = vsel %vm223_vm3, %v220_v5, %v222_v7  ;;  %v384_v10 = vsel %vm383_vm4, %v380_v4, %v382_v6 }
  0x88   : > { %610 = vmatpush3.msk.msra.mxu0 %vm229_vm1, %v224_v9 }
  0x89   : > { %612 = vmatmul.mubr.msk.f32.vlgmr.msra.gmra.mxu0 %vm225_vm2, %v592_v8  ;;  %619 = vmatprep.subr.mxu0 %v677_v0 }
  0x8a   : > { %620 = vmatpush3.msk.msra.mxu0 %vm229_vm1, %v384_v10  ;;  %621 = vmatprep.mubr.msk.f32.mxu0 %vm678_vm0, %v677_v0 }
  0x8d   : > { %622 = vmatmul.mubr.msk.f32.vlgmr.msra.gmra.mxu0 %vm225_vm2, %v597_v11 }
  0xd2   : > { %v373_v12 = vpop.f32.mrf.mxu1 }
  0xd4   : > { %v618_v13 = vpop.f32.mrf.mxu1 }
 0x149   : > { %v298_v15 = vpop.f32.mrf.mxu0 }
 0x14a   : > { %v374_v18 = vadd.f32 %v373_v12, %v298_v15 }
 0x14b   : > { %v613_v17 = vpop.f32.mrf.mxu0 }
 0x14d   : > { %v456_v19 = vpop.f32.mrf.mxu0 }
 0x14e   : > { %v460_v20 = vadd.f32 %v456_v19, %v374_v18 }
 0x14f   : > { %v623_v21 = vpop.f32.mrf.mxu0 }
 0x150   : > { %v469_v22 = vsel %vm466_vm6, %v460_v20, 0.0 }
 0x151   : > { %471 = vadd.xlane.f32.xlu0 %v469_v22  ;;  %v477_v23 = vmul.f32 %v469_v22, %v469_v22 }
 0x153   : > { %478 = vadd.xlane.f32.xlu1 %v477_v23 }
 0x1da   : > { %v472_v25 = vpop.xlane.xlu0 %471 }
 0x1db   : > { %v473_v27 = vadd.f32 %v472_v25, %v470_v24 }
 0x1dc   : > { %v479_v28 = vpop.xlane.xlu1 %478 }
 0x1dd   : > { %475 = vst.msk [vmem:[%s201_s30] sm:$0xff] %vm210_vm5, %v473_v27  ;;  %v480_v29 = vadd.f32 %v479_v28, %v476_v26 }
 0x1df   : > { %481 = vst.msk [vmem:[%s205_s6] sm:$0xff] %vm210_vm5, %v480_v29 }
 0x1e0 PF: > { %s14_s14 = sadd.s32 1, %s675_s14   ;;  %s768_s12 = smov %s671_s13 }
 0x1e1   : > { %p11_p5 = scmp.ge.s32.totalorder %s14_s14, 4   ;;  %s769_s13 = smov %s771_s15 }
 0x1e3   :  { %13 = sbr.rel (!%p11_p5) target bundleno = 2 (0x2), region = 76 }

// kernel: conv1d_bn.3
= control target key start
LH: loop header
LB: loop body
LE: loop exit
PB: predicated region body
PF: predicated region fallthrough
CT: control target
= control target key end

     0   :  { %9 = vsyncpa [#allocation3], 0  ;;  %s917_s0 = inlined_call_operand.vmem [shape: f32[2,1,4,130], index: 0, kind: input, shape index: {}]   ;;  %s918_s1 = inlined_call_operand.vmem [shape: f32[3,8,4], index: 1, kind: input, shape index: {}]   ;;  %s919_s2 = inlined_call_operand.vmem [shape: f32[8,1], index: 2, kind: input, shape index: {}]   ;;  %s920_s3 = inlined_call_operand.vmem [shape: f32[8,1], index: 3, kind: input, shape index: {}]   ;;  %s921_s4 = inlined_call_operand.hbm [shape: f32[2,8,16], index: 4, kind: output, shape index: {}]  }
   0x1   :  { %11 = vsyncpa [#allocation3 + $0x1], 0  ;;  %s794_s15 = smov 0   ;;  %s796_s16 = smov 0  }
   0x2   :  { %s798_s17 = smov 0   ;;  %s800_s18 = smov 0  }
   0x3   :  { %s802_s19 = smov 0   ;;  %s804_s20 = smov 0  }
   0x4 LB: > { %s580_s21 = sadd.s32 4294967295, %s761_s20   ;;  %s581_s22 = sadd.s32 4294967294, %s761_s20   ;;  %s761_s20 = sphi %s804_s20, %s17_s20   ;;  %s757_s19 = sphi %s802_s19, %s928_s19   ;;  %s753_s18 = sphi %s800_s18, %s927_s18   ;;  %s749_s17 = sphi %s798_s17, %s926_s17   ;;  %s745_s16 = sphi %s796_s16, %s925_s16   ;;  %s741_s15 = sphi %s794_s15, %s924_s15  }
   0x5   : > { %s29_s23 = sadd.s32 1, %s757_s19  ;;  %s129_s24 = sadd.s32 1, %s749_s17 }
   0x6   : > { %p31_p0 = scmp.ge.s32.totalorder %s29_s23, 2  ;;  %p139_p1 = scmp.ne.s32.totalorder %s749_s17, %s745_s16 }
   0x7   : > { %p140_p2 = scmp.eq.s32.totalorder %s580_s21, 1  ;;  %p145_p3 = scmp.ne.s32.totalorder %s745_s16, %s741_s15 }
   0x8   : > { %s930_s23 = smov (%p31_p0, %s29_s23), 0  ;;  %p146_p5 = scmp.eq.s32.totalorder %s581_s22, 1 }
   0x9   : > { %p834_p4 = por %p140_p2, %p139_p1  ;;  %s124_s26 = ssub.s32 %s757_s19, %s930_s23 }
   0xa   : > { %p584_p6 = scmp.ge.s32.totalorder %s761_s20, 1  ;;  %p127_p7 = scmp.eq.s32.totalorder %s124_s26, 0 }
   0xb   : > { %p841_p8 = por %p146_p5, %p145_p3  ;;  %p185_p9 = scmp.lt.s32.totalorder %s761_s20, 3 }
   0xc   : > { %s847_s28 = scalar_select %p127_p7, %s749_s17, %s129_s24  }
   0xd   : > { %p186_p10 = pnand %p584_p6, %p185_p9 }
   0xe   : > { %p215_p11 = scmp.lt.s32.totalorder (!%p186_p10), %s753_s18, 1  ;;  %s766_s10 = smov (!%p186_p10), 126  }
   0xf   : > { %189 = sbr.rel (%p186_p10) target bundleno = 364 (0x16c), region = 36  ;;  %s767_s11 = smov (!%p186_p10), 127  }
  0x10   : > { %s597_s6 = sshll.u32 (!%p186_p10), %s753_s18, 7  ;;  %s768_s14 = smov (!%p186_p10), [#allocation2]  }
  0x11   : > { %s689_s21 = sshll.u32 (!%p186_p10), %s768_s14, 4  ;;  %s690_s21 = int_to_ptr.vmem [resolvable:$false] %s689_s21 }
  0x14   : > { %v763_v0 = vmov 0.0   ;;  %s216_s29 = scalar_select %p215_p11, %s753_s18, 1  ;;  %vm764_vm0 = vmmov 0   ;;  %vm240_vm1 = vcmask 1043456   ;;  %v765_v1 = vmov 0   ;;  %v225_v3 = vld [vmem:[%s918_s1] sm:$0xff] }
  0x15   : > { %607 = vmatprep.subr.mxu0 %v763_v0  ;;  %612 = vmatprep.subr.mxu1 %v763_v0  ;;  %vm236_vm2 = vcmask 31744   ;;  %v472_v5 = vld [vmem:[%s919_s2] sm:$0xff]  ;;  %vm234_vm3 = vcmask 1039360   ;;  %vm394_vm4 = vcmask 1031168   ;;  %v588_v11 = vld [vmem:[%s918_s1 + $0x8] sm:$0xff]  ;;  %v593_v14 = vld [vmem:[%s918_s1 + $0x10] sm:$0xff] }
  0x16   : > { %609 = vmatprep.mubr.msk.f32.mxu0 %vm764_vm0, %v763_v0  ;;  %614 = vmatprep.mubr.msk.f32.mxu1 %vm764_vm0, %v763_v0  ;;  %s600_s30 = sshll.u32 %s216_s29, 3  ;;  %v479_v6 = vld [vmem:[%s920_s3] sm:$0xff]  ;;  %s691_s18 = scalar_lea.vmem %s690_s21, 256 }
  0x17   : > { %s223_s7 = scalar_lea.vmem %s917_s0, %s600_s30  ;;  %682 = vset.pattern.permute.xlu0 %v765_v1  ;;  %683 = vset.pattern.permute.xlu1 %v765_v1  ;;  %s212_s30 = sand.u32 1, %s745_s16  }
  0x18   : > { %v224_v2 = vld [vmem:[%s223_s7] sm:$0xff]  ;;  %s585_s5 = sshll.u32 %s212_s30, 3  ;;  %s489_s12 = scalar_lea.sflag [#allocation3], %s212_s30 }
  0x19   : > { %390 = vrot.lane.b32.xlu1 %v224_v2, %s766_s10  ;;  %230 = vrot.lane.b32.xlu0 %v224_v2, %s767_s11  ;;  %v229_v4 = vcombine.high %v224_v2, %v224_v2  ;;  %s214_s7 = scalar_lea.vmem [#allocation2], %s585_s5 }
  0x1a   : > { %613 = vmatpush3.msk.msra.mxu1 %vm240_vm1, %v224_v2  ;;  %s503_s8 = sshll.u32 %s214_s7, 4  ;;  %s504_s8 = int_to_ptr.vmem [resolvable:$true] %s503_s8 }
  0x1b   : > { %615 = vmatmul.mubr.msk.f32.vlgmr.msra.gmra.mxu1 %vm236_vm2, %v225_v3  ;;  %s685_s13 = scalar_lea.vmem %s504_s8, 128  ;;  %p692_p1 = scmp.lt.s32.totalorder %s504_s8, %s690_s21 }
  0x1c   : > { %p686_p12 = scmp.ne.s32.totalorder %s504_s8, %s685_s13  ;;  %p693_p2 = scmp.lt.s32.totalorder %s691_s18, %s685_s13 }
  0x1d   : > { %392 = vrot.lane.b32.xlu1 %v229_v4, %s766_s10  ;;  %232 = vrot.lane.b32.xlu0 %v229_v4, %s767_s11  ;;  %s501_s11 = scalar_lea.hbm %s921_s4, %s597_s6 }
  0x1e   : > { %p687_p13 = pnand %p686_p12, %p834_p4  ;;  %p694_p3 = por %p693_p2, %p692_p1 }
  0x20   : > { %p688_p0 = pneg %p687_p13 }
  0x21   : > { %475 = vperm.xlu0 %682, %v472_v5   ;;  %482 = vperm.xlu1 %683, %v479_v6  }
  0x22   : > { %p695_p5 = pnand %p694_p3, %p688_p0 }
  0x8b   : > { %v391_v7 = vpop.permute.xlu1 %390  ;;  %v231_v8 = vpop.permute.xlu0 %230 }
  0x8f   : > { %v393_v9 = vpop.permute.xlu1 %392  ;;  %v233_v10 = vpop.permute.xlu0 %232 }
  0x90   : > { %v235_v12 = vsel %vm234_vm3, %v231_v8, %v233_v10  ;;  %v395_v13 = vsel %vm394_vm4, %v391_v7, %v393_v9 }
  0x91   : > { %608 = vmatpush3.msk.msra.mxu0 %vm240_vm1, %v235_v12 }
  0x92   : > { %610 = vmatmul.mubr.msk.f32.vlgmr.msra.gmra.mxu0 %vm236_vm2, %v588_v11  ;;  %617 = vmatprep.subr.mxu0 %v763_v0 }
  0x93   : > { %618 = vmatpush3.msk.msra.mxu0 %vm240_vm1, %v395_v13  ;;  %619 = vmatprep.mubr.msk.f32.mxu0 %vm764_vm0, %v763_v0 }
  0x96   : > { %620 = vmatmul.mubr.msk.f32.vlgmr.msra.gmra.mxu0 %vm236_vm2, %v593_v14 }
  0x9c   : > { %v476_v21 = vpop.permute.xlu0 %475  ;;  %v483_v24 = vpop.permute.xlu1 %482 }
  0xdb   : > { %v384_v15 = vpop.f32.mrf.mxu1 }
  0xdd   : > { %v616_v16 = vpop.f32.mrf.mxu1 }
 0x152   : > { %v309_v17 = vpop.f32.mrf.mxu0 }
 0x153   : > { %v385_v19 = vadd.f32 %v384_v15, %v309_v17 }
 0x154   : > { %v611_v18 = vpop.f32.mrf.mxu0 }
 0x156   : > { %v467_v20 = vpop.f32.mrf.mxu0 }
 0x157   : > { %v471_v22 = vadd.f32 %v467_v20, %v385_v19 }
 0x158   : > { %v621_v23 = vpop.f32.mrf.mxu0 }
 0x159   : > { %v478_v25 = vmul.f32 %v476_v21, %v471_v22 }
 0x15b   : > { %v485_v26 = vadd.f32 %v483_v24, %v478_v25 }
 0x15d   : > { %v486_v27 = vmax.f32 %v485_v26, 0.0 }
 0x15f   : > { %487 = vst [vmem:[%s214_s7] sm:$0xff] %v486_v27 }
 0x160   : > { %698 = shalt.err (!%p695_p5)
}
 0x161   : > { %s699_s22 = scalar_lea.hbm %s501_s11, 128  ;;  %s703_s29 = scalar_lea.hbm %s921_s4, 256 }
 0x162   : > { %p700_p6 = scmp.ne.s32.totalorder %s501_s11, %s699_s22  ;;  %p704_p10 = scmp.lt.s32.totalorder %s501_s11, %s921_s4 }
 0x163   : > { %p705_p11 = scmp.lt.s32.totalorder %s703_s29, %s699_s22 }
 0x164   : > { %p701_p7 = pnand %p700_p6, %p834_p4 }
 0x165   : > { %p706_p12 = por %p705_p11, %p704_p10 }
 0x166   : > { %p702_p9 = pneg %p701_p7 }
 0x168   : > { %p707_p13 = pnand %p706_p12, %p702_p9 }
 0x16a   : > { %710 = shalt.err (!%p707_p13)
}
 0x16b   : > { %622 = dma.vmem_to_hbm [thread:$0]  (%p834_p4), %s504_s8, 128, %s501_s11, %s489_s12  }
 0x16c PF: > { %p628_p0 = scmp.ge.s32.totalorder %s761_s20, 2  ;;  %s515_s6 = sand.u32 1, %s741_s15  }
 0x16d   : > { %s516_s7 = scalar_lea.sflag [#allocation3], %s515_s6 }
 0x16e   : > { %p625_p1 = pnand %p628_p0, %p841_p8 }
 0x170   : > { %p626_p2 = pneg %p625_p1 }
 0x172   : > { %736 = dma.done.wait (%p626_p2), %s516_s7, 128  }
 0x173   : > { %738 = vsyncadd (%p626_p2), %s516_s7, 4294967168  ;;  %s17_s20 = sadd.s32 1, %s761_s20   ;;  %s924_s15 = smov %s745_s16 }
 0x174   : > { %p14_p3 = scmp.ge.s32.totalorder %s17_s20, 4   ;;  %s925_s16 = smov %s749_s17 }
 0x175   : > { %s926_s17 = smov %s847_s28  ;;  %s927_s18 = smov %s757_s19 }
 0x176   : > { %s928_s19 = smov %s930_s23  ;;  %16 = sbr.rel (!%p14_p3) target bundleno = 4 (0x4), region = 73 }
 0x17b   :  { %521 = vsyncpa [#allocation3], 1 }
 0x17c   :  { %523 = vsyncpa [#allocation3 + $0x1], 1 }

</bundles_post_ra>
